<compile_context>
chip_gen: v7x
topology: tpu7x:2x2x1
jax: 0.10.0
libtpu: 0.0.40
codegen_flags: <defaults>
</compile_context>

<pallas_src>
import functools

import jax
import jax.numpy as jnp
from jax.experimental import pallas as pl
from jax.experimental.pallas import tpu as pltpu

_LANE = 128


def _round_up(x, m):
    return (x + m - 1) // m * m


def robotnet_kernel(feat_ref, bbox_ref, w_ref, bias_ref, out_ref, *, feat_dim):
    # feat_ref : (TILE_B, F)        bbox_ref : (TILE_B, 4*O)
    # w_ref    : (F + 4*O, 4)       bias_ref : (1, 4)
    # out_ref  : (TILE_B, 4)
    # cat(f, b) @ W == f @ W[:F] + b @ W[F:]  (static weight slices, zero-cost
    # views; MXU is idle >99% of the time here so two small dots are free).
    acc = jnp.dot(
        feat_ref[...], w_ref[:feat_dim, :], preferred_element_type=jnp.float32
    )
    acc = acc + jnp.dot(
        bbox_ref[...], w_ref[feat_dim:, :], preferred_element_type=jnp.float32
    )
    out_ref[...] = (acc + bias_ref[...]).astype(out_ref.dtype)


def robotnet_forward(
    feature,
    bbox,
    weight,
    bias,
    *,
    tile_b=4096,
    vmem_block_budget_bytes=16 << 20,
    force_pallas=False,
):
    """feature: (B, F); bbox: (B, 4*O); weight: (F + 4*O, 4) (PyTorch
    fc1.weight.T); bias: (4,). Returns (B, 4) float32."""
    B, F = feature.shape
    Bb, D_bbox = bbox.shape
    assert B == Bb
    D_in, D_out = weight.shape
    assert D_in == F + D_bbox and D_out == 4

    itemsize = jnp.dtype(feature.dtype).itemsize
    w_itemsize = jnp.dtype(weight.dtype).itemsize
    # Sublane packing: 8 rows for 32-bit, 16 for 16-bit, 32 for 8-bit dtypes.
    sublane = 8 * max(1, 4 // itemsize)

    # --- VMEM-accurate tile sizing (blocks are lane-padded to 128) ----------
    # Per-row, per-buffer padded bytes for the streamed blocks (feat+bbox in,
    # f32 out); x2 for double buffering.
    pad_in = (_round_up(F, _LANE) + _round_up(D_bbox, _LANE)) * itemsize
    pad_out = _round_up(D_out, _LANE) * 4
    per_row_db = 2 * (pad_in + pad_out)
    max_rows = max(sublane, (vmem_block_budget_bytes // per_row_db) // sublane * sublane)
    tile_b = max(sublane, min(_round_up(tile_b, sublane), max_rows))

    # Below one tile there is a single grid step: pallas_call dispatch +
    # prologue can't be amortized, XLA's fused concat+dot is at least as fast.
    if B < tile_b and not force_pallas:
        return (
            jnp.concatenate([feature, bbox], axis=1) @ weight
            + bias.reshape(1, D_out)
        ).astype(jnp.float32)

    # Keep >=4 grid steps when possible so both v7x TensorCores get batch
    # tiles (harmless on single-TC v5e/v6e); then clamp to the batch itself.
    while tile_b > 512 and pl.cdiv(B, tile_b) < 4:
        tile_b //= 2
    tile_b = max(sublane, (tile_b // sublane) * sublane)
    tile_b = min(tile_b, _round_up(B, sublane))

    grid = (pl.cdiv(B, tile_b),)

    # Explicit scoped-VMEM limit from the padded estimate (+ resident weight/
    # bias + headroom); stays well under every generation's physical VMEM.
    weight_bytes = 2 * _round_up(D_in, 8) * _round_up(D_out, _LANE) * w_itemsize
    vmem_limit = min(
        max(tile_b * per_row_db + weight_bytes + (4 << 20), 8 << 20), 48 << 20
    )

    bias2d = bias.reshape(1, D_out).astype(jnp.float32)

    cost = pl.CostEstimate(
        flops=2 * B * D_in * D_out,
        transcendentals=0,
        bytes_accessed=(
            B * (F + D_bbox) * itemsize          # feature + bbox reads
            + D_in * D_out * w_itemsize          # weight
            + D_out * 4                          # bias
            + B * D_out * 4                      # output writes
        ),
    )

    kernel = functools.partial(robotnet_kernel, feat_dim=F)

    out = pl.pallas_call(
        kernel,
        out_shape=jax.ShapeDtypeStruct((B, D_out), jnp.float32),
        grid_spec=pltpu.PrefetchScalarGridSpec(
            num_scalar_prefetch=0,
            grid=grid,
            in_specs=[
                pl.BlockSpec((tile_b, F), lambda i: (i, 0)),        # streamed
                pl.BlockSpec((tile_b, D_bbox), lambda i: (i, 0)),   # streamed
                pl.BlockSpec((D_in, D_out), lambda i: (0, 0)),      # resident
                pl.BlockSpec((1, D_out), lambda i: (0, 0)),         # resident
            ],
            out_specs=pl.BlockSpec((tile_b, D_out), lambda i: (i, 0)),
        ),
        compiler_params=pltpu.CompilerParams(
            dimension_semantics=("parallel",),   # shard batch across TCs (v7x)
            vmem_limit_bytes=int(vmem_limit),
        ),
        cost_estimate=cost,
    )(feature, bbox, weight, bias2d)

    return out


if __name__ == "__main__":
    # Small shapes consistent with the module.
    batch = 2
    feature_dim = 32
    object_num = 4
    bbox_dim = 4 * object_num          # 16
    d_in = feature_dim + bbox_dim      # 48
    d_out = 4

    key = jax.random.PRNGKey(0)
    k_feat, k_bbox, k_w, k_b = jax.random.split(key, 4)

    feature = jax.random.normal(k_feat, (batch, feature_dim), dtype=jnp.float32)
    bbox = jax.random.normal(k_bbox, (batch, bbox_dim), dtype=jnp.float32)

    # Deterministic "PyTorch-like" init: U(-1/sqrt(d_in), 1/sqrt(d_in)).
    bound = 1.0 / (d_in ** 0.5)
    weight = jax.random.uniform(
        k_w, (d_in, d_out), minval=-bound, maxval=bound, dtype=jnp.float32
    )
    bias = jax.random.uniform(
        k_b, (d_out,), minval=-bound, maxval=bound, dtype=jnp.float32
    )

    # force_pallas=True so the Pallas path (incl. the ragged last block at
    # this tiny batch) is exercised rather than the XLA small-batch fallback.
    out = robotnet_forward(feature, bbox, weight, bias, force_pallas=True)
    out = jax.block_until_ready(out)

    # Cross-check against plain JAX reference (cat + linear).
    ref = jnp.concatenate([feature, bbox], axis=1) @ weight + bias
    assert out.shape == (batch, d_out)
    assert jnp.allclose(out, ref, atol=1e-5, rtol=1e-5)

    print("KERNEL_OK")
</pallas_src>

<mosaic_0001>
module attributes {stable_mosaic.version = 11 : i64} {
  func.func @robotnet_kernel(%arg0: i32, %arg1: memref<8x32xf32, #tpu.memory_space<vmem>>, %arg2: memref<8x16xf32, #tpu.memory_space<vmem>>, %arg3: memref<48x4xf32, #tpu.memory_space<vmem>>, %arg4: memref<1x4xf32, #tpu.memory_space<vmem>>, %arg5: memref<8x4xf32, #tpu.memory_space<vmem>>) attributes {dimension_semantics = [#tpu.dimension_semantics<parallel>], iteration_bounds = array<i64: 1>, scalar_prefetch = 0 : i64, scratch_operands = 0 : i64, tpu.core_type = #tpu.core_type<tc>, window_params = [{transform_indices = @transform_0, window_bounds = array<i64: 8, 32>}, {transform_indices = @transform_1, window_bounds = array<i64: 8, 16>}, {pipeline_mode = #tpu.pipeline_mode<synchronous>, transform_indices = @transform_2, window_bounds = array<i64: 48, 4>}, {pipeline_mode = #tpu.pipeline_mode<synchronous>, transform_indices = @transform_3, window_bounds = array<i64: 1, 4>}, {transform_indices = @transform_4, window_bounds = array<i64: 8, 4>}]} {
    %c0 = arith.constant 0 : index
    %c0_0 = arith.constant 0 : index
    %0 = vector.load %arg1[%c0, %c0_0] : memref<8x32xf32, #tpu.memory_space<vmem>>, vector<8x32xf32>
    %c0_1 = arith.constant 0 : index
    %c0_2 = arith.constant 0 : index
    %1 = vector.load %arg3[%c0_1, %c0_2] : memref<48x4xf32, #tpu.memory_space<vmem>>, vector<32x4xf32>
    %cst = arith.constant dense<0.000000e+00> : vector<8x4xf32>
    %2 = tpu.matmul %0, %1, %cst {dimension_numbers = #tpu.dot_dimension_numbers<[1], [0], [0], [1], [0, 0, 1, 1], [], []>} : vector<8x32xf32>, vector<32x4xf32>, vector<8x4xf32> -> vector<8x4xf32>
    %c0_3 = arith.constant 0 : index
    %c0_4 = arith.constant 0 : index
    %3 = vector.load %arg2[%c0_3, %c0_4] : memref<8x16xf32, #tpu.memory_space<vmem>>, vector<8x16xf32>
    %c32 = arith.constant 32 : index
    %c0_5 = arith.constant 0 : index
    %4 = vector.load %arg3[%c32, %c0_5] : memref<48x4xf32, #tpu.memory_space<vmem>>, vector<16x4xf32>
    %cst_6 = arith.constant dense<0.000000e+00> : vector<8x4xf32>
    %5 = tpu.matmul %3, %4, %cst_6 {dimension_numbers = #tpu.dot_dimension_numbers<[1], [0], [0], [1], [0, 0, 1, 1], [], []>} : vector<8x16xf32>, vector<16x4xf32>, vector<8x4xf32> -> vector<8x4xf32>
    %6 = arith.addf %2, %5 : vector<8x4xf32>
    %c0_7 = arith.constant 0 : index
    %c0_8 = arith.constant 0 : index
    %7 = vector.load %arg4[%c0_7, %c0_8] : memref<1x4xf32, #tpu.memory_space<vmem>>, vector<1x4xf32>
    %8 = vector.broadcast %7 : vector<1x4xf32> to vector<8x4xf32>
    %9 = arith.addf %6, %8 : vector<8x4xf32>
    %c0_9 = arith.constant 0 : index
    %c0_10 = arith.constant 0 : index
    %10 = vector.load %arg5[%c0_9, %c0_10] : memref<8x4xf32, #tpu.memory_space<vmem>>, vector<8x4xf32>
    tpu.vector_store %arg5[%c0_9, %c0_10], %9 {strides = array<i32>} : memref<8x4xf32, #tpu.memory_space<vmem>>, vector<8x4xf32>,
    return
  }
  func.func @transform_0(%arg0: i32) -> (i32, i32) {
    %c0_i32 = arith.constant 0 : i32
    %c0_i32_0 = arith.constant 0 : i32
    return %arg0, %c0_i32 : i32, i32
  }
  func.func @transform_1(%arg0: i32) -> (i32, i32) {
    %c0_i32 = arith.constant 0 : i32
    %c0_i32_0 = arith.constant 0 : i32
    return %arg0, %c0_i32 : i32, i32
  }
  func.func @transform_2(%arg0: i32) -> (i32, i32) {
    %c0_i32 = arith.constant 0 : i32
    %c0_i32_0 = arith.constant 0 : i32
    %c0_i32_1 = arith.constant 0 : i32
    return %c0_i32, %c0_i32_0 : i32, i32
  }
  func.func @transform_3(%arg0: i32) -> (i32, i32) {
    %c0_i32 = arith.constant 0 : i32
    %c0_i32_0 = arith.constant 0 : i32
    %c0_i32_1 = arith.constant 0 : i32
    return %c0_i32, %c0_i32_0 : i32, i32
  }
  func.func @transform_4(%arg0: i32) -> (i32, i32) {
    %c0_i32 = arith.constant 0 : i32
    %c0_i32_0 = arith.constant 0 : i32
    return %arg0, %c0_i32 : i32, i32
  }
}

</mosaic_0001>

<bundles_post_ra>
// kernel: tpu_custom_call.1
= control target key start
LH: loop header
LB: loop body
LE: loop exit
PB: predicated region body
PF: predicated region fallthrough
CT: control target
= control target key end

     0   :  { %s338_s0 = inlined_call_operand.vmem [shape: f32[2,32], index: 0, kind: input, shape index: {}]   ;;  %s339_s1 = inlined_call_operand.vmem [shape: f32[2,16], index: 1, kind: input, shape index: {}]   ;;  %s340_s2 = inlined_call_operand.vmem [shape: f32[48,4], index: 2, kind: input, shape index: {}]   ;;  %s341_s3 = inlined_call_operand.vmem [shape: f32[1,4], index: 3, kind: input, shape index: {}]   ;;  %s342_s4 = inlined_call_operand.hbm [shape: f32[2,4], index: 4, kind: output, shape index: {}]  }
   0x1   :  { %v19_v0 = vld [vmem:[%s340_s2] sm:$0xff]  ;;  %v20_v1 = vld [vmem:[%s340_s2 + $0x8] sm:$0xff] }
   0x2   :  { %9 = vsyncpa [#allocation3], 0  ;;  %v268_v2 = vmov 0.0|0.0   ;;  %v233_v3 = vpack.c.bf16 %v20_v1, %v19_v0  ;;  %v24_v4 = vld [vmem:[%s340_s2 + $0x20] sm:$0xff]  ;;  %v25_v5 = vld [vmem:[%s340_s2 + $0x28] sm:$0xff]  ;;  %vm269_vm0 = vmmov 0  }
   0x3   :  { %232 = vmatprep.subr.bf16.mxu1 %v268_v2  ;;  %229 = vmatprep.subr.bf16.mxu0 %v268_v2  ;;  %v21_v6 = vld [vmem:[%s340_s2 + $0x10] sm:$0xff]  ;;  %v230_v7 = vpack.c.bf16 %v25_v5, %v24_v4  ;;  %v22_v8 = vld [vmem:[%s340_s2 + $0x18] sm:$0xff]  ;;  %v270_v9 = vmov 0.0   ;;  %v23_v11 = vld [vmem:[%s339_s1] sm:$0xff]  ;;  %vm26_vm1 = vcmask 130048   ;;  %vm100_vm2 = vcmask 261120  }
   0x4   :  { %215 = vmatprep.mubr.msk.f32.mxu0 %vm269_vm0, %v270_v9  ;;  %226 = vmatprep.mubr.msk.f32.mxu1 %vm269_vm0, %v270_v9  ;;  %v236_v10 = vpack.c.bf16 %v22_v8, %v21_v6  ;;  %v18_v12 = vld [vmem:[%s338_s0] sm:$0xff]  ;;  %vm182_vm3 = vcmask 31744  }
   0x5   :  { %234 = vmatpush3.bf16.msra.mxu1 %v233_v3  ;;  %231 = vmatpush3.bf16.msra.mxu0 %v230_v7  ;;  %v202_v16 = vld [vmem:[%s341_s3] ss:$0 sm:$0xff] }
   0x6   :  { %235 = vmatprep.subr.bf16.mxu1 %v268_v2 }
   0x8   :  { %216 = vmatmul.mubr.msk.f32.vlgmr.msra.gmra.mrb[0].mxu0 %vm26_vm1, %v23_v11 }
   0x9   :  { %237 = vmatpush3.bf16.msra.mxu1 %v236_v10 }
   0xc   :  { %227 = vmatmul.mubr.msk.f32.vlgmr.msra.gmra.mrb[0].mxu1 %vm100_vm2, %v18_v12 }
  0xdb   :  { %v96_v13 = vpop.f32.mrb[0].mxu0 }
  0xdc   :  { %v217_v14 = vpop.f32.mrb[1].mxu0 }
  0xdf   :  { %v170_v15 = vpop.f32.mrb[0].mxu1 }
  0xe0   :  { %v171_v17 = vadd.f32 %v170_v15, %v96_v13  ;;  %v228_v18 = vpop.f32.mrb[1].mxu1 }
  0xe2   :  { %v181_v19 = vadd.f32 %v202_v16, %v171_v17 }
  0xe4   :  { %183 = vst.msk [vmem:[#allocation2] sm:$0xff] %vm182_vm3, %v181_v19 }
  0xe5   :  { %188 = vsyncadd [#allocation3], 96  ;;  %s271_s1 = smov [#allocation2]  }
  0xe6   :  { %s189_s6 = sshll.u32 %s271_s1, 4  ;;  %s190_s6 = int_to_ptr.vmem [resolvable:$true] %s189_s6 }
  0xe7   :  { %s244_s7 = scalar_lea.vmem %s190_s6, 32  ;;  %s248_s0 = scalar_lea.vmem %s190_s6, 128 }
  0xe8   :  { %p245_p0 = scmp.ne.s32.totalorder %s190_s6, %s244_s7  ;;  %p249_p1 = scmp.lt.s32.totalorder %s190_s6, %s190_s6 }
  0xe9   :  { %p250_p2 = scmp.lt.s32.totalorder %s248_s0, %s244_s7 }
  0xeb   :  { %p251_p3 = por %p250_p2, %p249_p1 }
  0xed   :  { %p252_p4 = pnand %p251_p3, %p245_p0 }
  0xef   :  { %255 = shalt.err (!%p252_p4)
}
  0xf0   :  { %s256_s3 = scalar_lea.hbm %s342_s4, 32 }
  0xf1   :  { %p257_p5 = scmp.ne.s32.totalorder %s342_s4, %s256_s3  ;;  %p260_p6 = scmp.lt.u32.totalorder %s256_s3, %s342_s4 }
  0xf3   :  { %p262_p7 = pnand %p260_p6, %p257_p5 }
  0xf5   :  { %265 = shalt.err (!%p262_p7)
}
  0xf6   :  { %s272_s14 = smov 32   ;;  %s273_s15 = smov 2  }
  0xf7   :  { %195 = dma.vmem_to_hbm [thread:$0]  %s190_s6, 32, %s342_s4, [#allocation3], %s272_s14, %s272_s14, %s273_s15  }
  0xf8   :  { %266 = dma.done.wait [#allocation3], 128  }
  0xf9   :  { %267 = vsyncadd [#allocation3], 4294967168 }
  0xfa   :  { %199 = vsyncpa [#allocation3], 1 }

</bundles_post_ra>
